<compile_context>
chip_gen: v5e
topology: v5e:2x2
jax: 0.10.0
libtpu: 0.0.40
codegen_flags: <defaults>
</compile_context>

<pallas_src>
import jax
import jax.numpy as jnp
from jax.experimental import pallas as pl
from jax.experimental.pallas import tpu as pltpu


def _mlp_kernel(x_ref, w1_ref, b1_ref, w2_ref, b2_ref, o_ref):
    # x_ref : (tm, d_in)    f32   (channel-0 slab of the batch tile)
    # w1_ref: (d_in, 512)   bf16
    # b1_ref: (1, 512)      f32
    # w2_ref: (512, 128)    bf16  (cols 64..127 are zero padding)
    # b2_ref: (1, 128)      f32   (cols 64..127 are zero padding)
    # o_ref : (tm, 128)     f32
    x = x_ref[...].astype(jnp.bfloat16)
    h = jnp.dot(x, w1_ref[...], preferred_element_type=jnp.float32)
    h = jnp.maximum(h + b1_ref[...], 0.0)          # Linear -> ReLU (f32)
    # Dropout(0.5) -> identity at inference.
    y = jnp.dot(h.astype(jnp.bfloat16), w2_ref[...],
                preferred_element_type=jnp.float32)
    y = jnp.maximum(y + b2_ref[...], 0.0)          # Linear -> ReLU (f32)
    # Dropout(0.5) -> identity at inference.
    o_ref[...] = y.astype(o_ref.dtype)


def arias2022_body_forward(x, w1, b1, w2p, b2p, *, block_b=256):
    """x: (B, C, H, W) float32. Returns (B, 64) float32."""
    B, C, H, W = x.shape
    d_in = H * W
    assert w1.shape == (d_in, 512), w1.shape
    n_pad = w2p.shape[1]               # 128 (lane-padded output width)

    # (B, C, H, W) -> (B, C*H*W): contiguous merge, no data movement.
    # Channel 0 of row b occupies columns [0, d_in), so the input BlockSpec's
    # constant column-block index 0 performs the channel select + flatten.
    x2d = x.reshape(B, C * d_in)

    # Batch tile: either the whole batch (small B) or a multiple of 8.
    if B <= block_b:
        tm = B
    else:
        tm = max(8, (block_b // 8) * 8)
    grid = (pl.cdiv(B, tm),)

    out_padded = pl.pallas_call(
        _mlp_kernel,
        out_shape=jax.ShapeDtypeStruct((B, n_pad), jnp.float32),
        grid=grid,
        in_specs=[
            # channel-0 slab of batch tile i (column-block 0 == channel 0)
            pl.BlockSpec((tm, d_in), lambda i: (i, 0)),
            # weights/biases: constant index_map -> fetched once, stay resident
            pl.BlockSpec((d_in, 512), lambda i: (0, 0)),
            pl.BlockSpec((1, 512), lambda i: (0, 0)),
            pl.BlockSpec((512, n_pad), lambda i: (0, 0)),
            pl.BlockSpec((1, n_pad), lambda i: (0, 0)),
        ],
        out_specs=pl.BlockSpec((tm, n_pad), lambda i: (i, 0)),
        compiler_params=pltpu.CompilerParams(
            dimension_semantics=("parallel",)),
    )(x2d, w1, b1, w2p, b2p)

    # Logical module output is 64-wide. (A fused consumer could keep the
    # lane-dense (B, 128) form instead of slicing here.)
    return out_padded[:, :64]


def init_params(key, d_in):
    """Kernel-layout parameters (prepared once, at load time).

    PyTorch stores: W1 (512, d_in), b1 (512,), W2 (64, 512), b2 (64,).
    Kernel layout:
      w1 : (d_in, 512) bf16   (transposed)
      b1 : (1, 512)    f32
      w2p: (512, 128)  bf16   (transposed, zero-padded 64 -> 128 lanes)
      b2p: (1, 128)    f32    (zero-padded 64 -> 128 lanes)
    """
    k1, k2, k3, k4 = jax.random.split(key, 4)
    lim1 = 1.0 / jnp.sqrt(d_in)
    lim2 = 1.0 / jnp.sqrt(512.0)
    w1 = jax.random.uniform(k1, (d_in, 512), jnp.float32, -lim1, lim1)
    b1 = jax.random.uniform(k2, (1, 512), jnp.float32, -lim1, lim1)
    w2 = jax.random.uniform(k3, (512, 64), jnp.float32, -lim2, lim2)
    b2 = jax.random.uniform(k4, (1, 64), jnp.float32, -lim2, lim2)

    w1 = w1.astype(jnp.bfloat16)
    w2p = jnp.zeros((512, 128), jnp.bfloat16).at[:, :64].set(
        w2.astype(jnp.bfloat16))
    b2p = jnp.zeros((1, 128), jnp.float32).at[:, :64].set(b2)
    return w1, b1, w2p, b2p


def reference_forward(x, w1, b1, w2p, b2p):
    """Pure-JAX reference with matching numerics (bf16 operands, f32 accum)."""
    B = x.shape[0]
    xf = x[:, 0, :, :].reshape(B, -1)
    h = jnp.dot(xf.astype(jnp.bfloat16), w1, preferred_element_type=jnp.float32)
    h = jnp.maximum(h + b1, 0.0)
    y = jnp.dot(h.astype(jnp.bfloat16), w2p, preferred_element_type=jnp.float32)
    y = jnp.maximum(y + b2p, 0.0)
    return y[:, :64]


if __name__ == "__main__":
    key = jax.random.PRNGKey(0)
    kx, kp, kx2 = jax.random.split(key, 3)

    B, C, H, W = 2, 4, 16, 16
    x = jax.random.normal(kx, (B, C, H, W), dtype=jnp.float32)
    w1, b1, w2p, b2p = init_params(kp, H * W)

    out = arias2022_body_forward(x, w1, b1, w2p, b2p)
    out = jax.block_until_ready(out)
    ref = reference_forward(x, w1, b1, w2p, b2p)
    assert out.shape == (B, 64), out.shape
    assert jnp.allclose(out, ref, atol=1e-2, rtol=1e-2), (
        f"max abs err = {jnp.max(jnp.abs(out - ref))}")

    # Exercise the batch-tiled, multi-grid-step (pipelined / megacore) path.
    B2 = 512
    x2 = jax.random.normal(kx2, (B2, C, H, W), dtype=jnp.float32)
    out2 = jax.block_until_ready(arias2022_body_forward(x2, w1, b1, w2p, b2p))
    ref2 = reference_forward(x2, w1, b1, w2p, b2p)
    assert out2.shape == (B2, 64), out2.shape
    assert jnp.allclose(out2, ref2, atol=1e-2, rtol=1e-2), (
        f"max abs err = {jnp.max(jnp.abs(out2 - ref2))}")

    print("KERNEL_OK")
</pallas_src>

<mosaic_0001>
module attributes {stable_mosaic.version = 11 : i64} {
  func.func @_mlp_kernel(%arg0: i32, %arg1: memref<2x256xf32, #tpu.memory_space<vmem>>, %arg2: memref<256x512xbf16, #tpu.memory_space<vmem>>, %arg3: memref<1x512xf32, #tpu.memory_space<vmem>>, %arg4: memref<512x128xbf16, #tpu.memory_space<vmem>>, %arg5: memref<1x128xf32, #tpu.memory_space<vmem>>, %arg6: memref<2x128xf32, #tpu.memory_space<vmem>>) attributes {dimension_semantics = [#tpu.dimension_semantics<parallel>], iteration_bounds = array<i64: 1>, scalar_prefetch = 0 : i64, scratch_operands = 0 : i64, tpu.core_type = #tpu.core_type<tc>, window_params = [{transform_indices = @transform_0, window_bounds = array<i64: 2, 256>}, {pipeline_mode = #tpu.pipeline_mode<synchronous>, transform_indices = @transform_1, window_bounds = array<i64: 256, 512>}, {pipeline_mode = #tpu.pipeline_mode<synchronous>, transform_indices = @transform_2, window_bounds = array<i64: 1, 512>}, {pipeline_mode = #tpu.pipeline_mode<synchronous>, transform_indices = @transform_3, window_bounds = array<i64: 512, 128>}, {pipeline_mode = #tpu.pipeline_mode<synchronous>, transform_indices = @transform_4, window_bounds = array<i64: 1, 128>}, {transform_indices = @transform_5, window_bounds = array<i64: 2, 128>}]} {
    %c0 = arith.constant 0 : index
    %c0_0 = arith.constant 0 : index
    %0 = vector.load %arg1[%c0, %c0_0] : memref<2x256xf32, #tpu.memory_space<vmem>>, vector<2x256xf32>
    %1 = arith.truncf %0 : vector<2x256xf32> to vector<2x256xbf16>
    %c0_1 = arith.constant 0 : index
    %c0_2 = arith.constant 0 : index
    %2 = vector.load %arg2[%c0_1, %c0_2] : memref<256x512xbf16, #tpu.memory_space<vmem>>, vector<256x512xbf16>
    %cst = arith.constant dense<0.000000e+00> : vector<2x512xf32>
    %3 = tpu.matmul %1, %2, %cst {dimension_numbers = #tpu.dot_dimension_numbers<[1], [0], [0], [1], [0, 0, 1, 1], [], []>} : vector<2x256xbf16>, vector<256x512xbf16>, vector<2x512xf32> -> vector<2x512xf32>
    %c0_3 = arith.constant 0 : index
    %c0_4 = arith.constant 0 : index
    %4 = vector.load %arg3[%c0_3, %c0_4] : memref<1x512xf32, #tpu.memory_space<vmem>>, vector<1x512xf32>
    %5 = vector.broadcast %4 : vector<1x512xf32> to vector<2x512xf32>
    %6 = arith.addf %3, %5 : vector<2x512xf32>
    %cst_5 = arith.constant 0.000000e+00 : f32
    %7 = vector.broadcast %cst_5 : f32 to vector<2x512xf32>
    %8 = arith.maximumf %6, %7 : vector<2x512xf32>
    %9 = arith.truncf %8 : vector<2x512xf32> to vector<2x512xbf16>
    %c0_6 = arith.constant 0 : index
    %c0_7 = arith.constant 0 : index
    %10 = vector.load %arg4[%c0_6, %c0_7] : memref<512x128xbf16, #tpu.memory_space<vmem>>, vector<512x128xbf16>
    %cst_8 = arith.constant dense<0.000000e+00> : vector<2x128xf32>
    %11 = tpu.matmul %9, %10, %cst_8 {dimension_numbers = #tpu.dot_dimension_numbers<[1], [0], [0], [1], [0, 0, 1, 1], [], []>} : vector<2x512xbf16>, vector<512x128xbf16>, vector<2x128xf32> -> vector<2x128xf32>
    %c0_9 = arith.constant 0 : index
    %c0_10 = arith.constant 0 : index
    %12 = vector.load %arg5[%c0_9, %c0_10] : memref<1x128xf32, #tpu.memory_space<vmem>>, vector<1x128xf32>
    %13 = vector.broadcast %12 : vector<1x128xf32> to vector<2x128xf32>
    %14 = arith.addf %11, %13 : vector<2x128xf32>
    %cst_11 = arith.constant 0.000000e+00 : f32
    %15 = vector.broadcast %cst_11 : f32 to vector<2x128xf32>
    %16 = arith.maximumf %14, %15 : vector<2x128xf32>
    %c0_12 = arith.constant 0 : index
    %c0_13 = arith.constant 0 : index
    %17 = vector.load %arg6[%c0_12, %c0_13] : memref<2x128xf32, #tpu.memory_space<vmem>>, vector<2x128xf32>
    tpu.vector_store %arg6[%c0_12, %c0_13], %16 {strides = array<i32>} : memref<2x128xf32, #tpu.memory_space<vmem>>, vector<2x128xf32>,
    return
  }
  func.func @transform_0(%arg0: i32) -> (i32, i32) {
    %c0_i32 = arith.constant 0 : i32
    %c0_i32_0 = arith.constant 0 : i32
    return %arg0, %c0_i32 : i32, i32
  }
  func.func @transform_1(%arg0: i32) -> (i32, i32) {
    %c0_i32 = arith.constant 0 : i32
    %c0_i32_0 = arith.constant 0 : i32
    %c0_i32_1 = arith.constant 0 : i32
    return %c0_i32, %c0_i32_0 : i32, i32
  }
  func.func @transform_2(%arg0: i32) -> (i32, i32) {
    %c0_i32 = arith.constant 0 : i32
    %c0_i32_0 = arith.constant 0 : i32
    %c0_i32_1 = arith.constant 0 : i32
    return %c0_i32, %c0_i32_0 : i32, i32
  }
  func.func @transform_3(%arg0: i32) -> (i32, i32) {
    %c0_i32 = arith.constant 0 : i32
    %c0_i32_0 = arith.constant 0 : i32
    %c0_i32_1 = arith.constant 0 : i32
    return %c0_i32, %c0_i32_0 : i32, i32
  }
  func.func @transform_4(%arg0: i32) -> (i32, i32) {
    %c0_i32 = arith.constant 0 : i32
    %c0_i32_0 = arith.constant 0 : i32
    %c0_i32_1 = arith.constant 0 : i32
    return %c0_i32, %c0_i32_0 : i32, i32
  }
  func.func @transform_5(%arg0: i32) -> (i32, i32) {
    %c0_i32 = arith.constant 0 : i32
    %c0_i32_0 = arith.constant 0 : i32
    return %arg0, %c0_i32 : i32, i32
  }
}

</mosaic_0001>

<bundles_post_ra>
// kernel: tpu_custom_call.1
= control target key start
LH: loop header
LB: loop body
LE: loop exit
PB: predicated region body
PF: predicated region fallthrough
CT: control target
= control target key end

     0   :  { %10 = vsyncpa [#allocation3], 0  ;;  %s1615_s0 = inlined_call_operand.hbm [shape: f32[2,1024], index: 0, kind: input, shape index: {}]   ;;  %s1616_s1 = inlined_call_operand.hbm [shape: bf16[256,512], index: 1, kind: input, shape index: {}]   ;;  %s1617_s2 = inlined_call_operand.hbm [shape: f32[1,512], index: 2, kind: input, shape index: {}]   ;;  %s1618_s3 = inlined_call_operand.hbm [shape: bf16[512,128], index: 3, kind: input, shape index: {}]   ;;  %s1619_s4 = inlined_call_operand.vmem [shape: f32[1,128], index: 4, kind: input, shape index: {}]   ;;  %s1620_s5 = inlined_call_operand.hbm [shape: f32[2,128], index: 5, kind: output, shape index: {}]  }
   0x1   :  { %11 = vsyncpa [#allocation6], 0 }
   0x2   :  { %12 = vsyncpa [#allocation9], 0  ;;  %s29_s20 = sshll.u32 %s1616_s1, 4  ;;  %s30_s20 = int_to_ptr.hbm [resolvable:$true] %s29_s20 }
   0x3   :  { %13 = vsyncpa [#allocation4], 0  ;;  %s1546_s21 = smov [#allocation5]   ;;  %s19_s25 = sshll.u32 %s1615_s0, 4  ;;  %s20_s25 = int_to_ptr.hbm [resolvable:$true] %s19_s25 }
   0x4   :  { %s31_s22 = sshll.u32 %s1546_s21, 4  ;;  %s1547_s26 = smov 256   ;;  %s32_s22 = int_to_ptr.vmem [resolvable:$true] %s31_s22 }
   0x5   :  { %s1548_s27 = smov 16   ;;  %s1549_s28 = smov [#allocation2]  }
   0x6   :  { %37 = dma.hbm_to_vmem [thread:$0]  %s30_s20, 8192, %s32_s22, [#allocation6], %s1547_s26, %s1547_s26, %s1548_s27  }
   0x7   :  { %s21_s29 = sshll.u32 %s1549_s28, 4  ;;  %s43_s7 = sshll.u32 %s1617_s2, 4  ;;  %s22_s29 = int_to_ptr.vmem [resolvable:$true] %s21_s29  ;;  %s44_s7 = int_to_ptr.hbm [resolvable:$true] %s43_s7 }
   0x8   :  { %24 = dma.hbm_to_vmem [thread:$0]  %s20_s25, 64, %s22_s29, [#allocation3]  }
   0x9   :  { %s53_s9 = sshll.u32 %s1618_s3, 4  ;;  %s1550_s10 = smov [#allocation7]   ;;  %s54_s9 = int_to_ptr.hbm [resolvable:$true] %s53_s9 }
   0xa   :  { %s45_s11 = sshll.u32 %s1550_s10, 4  ;;  %s1551_s0 = smov [#allocation8]   ;;  %s46_s11 = int_to_ptr.vmem [resolvable:$true] %s45_s11 }
   0xb   :  { %48 = dma.hbm_to_vmem [thread:$0]  %s44_s7, 64, %s46_s11, [#allocation6]  }
   0xc   :  { %s55_s12 = sshll.u32 %s1551_s0, 4  ;;  %s1552_s13 = smov 64   ;;  %s56_s12 = int_to_ptr.vmem [resolvable:$true] %s55_s12 }
   0xd   :  { %s1553_s14 = smov 4  }
   0xe   :  { %61 = dma.hbm_to_vmem [thread:$0]  %s54_s9, 4096, %s56_s12, [#allocation9], %s1552_s13, %s1552_s13, %s1553_s14  }
   0xf   :  { %1538 = dma.done.wait [#allocation3], 64  }
  0x10   :  { %1539 = vsyncadd [#allocation3], 4294967232 }
  0x11   :  { %1540 = dma.done.wait [#allocation6], 8256  }
  0x12   :  { %1541 = vsyncadd [#allocation6], 4294959040 }
  0x13   :  { %1542 = dma.done.wait [#allocation9], 4096  }
  0x14   :  { %1543 = vsyncadd [#allocation9], 4294963200  ;;  %v1042_v0 = vld [vmem:[#allocation5 + $0xe0] sm:$0xf]  ;;  %v1342_v1 = vld [vmem:[#allocation5 + $0xec] sm:$0xf0] }
  0x15   :  { %v1170_v2 = vld [vmem:[#allocation5 + $0x1e0] sm:$0xf]  ;;  %v1043_v3 = vor.u32 %v1342_v1, %v1042_v0  ;;  %v1374_v4 = vld [vmem:[#allocation5 + $0x1ec] sm:$0xf0]  ;;  %v1340_v5 = vld [vmem:[#allocation5 + $0xe4] sm:$0xf] }
  0x16   :  { %v1044_v6 = vld [vmem:[#allocation5 + $0xf0] sm:$0xf0]  ;;  %v1171_v7 = vor.u32 %v1374_v4, %v1170_v2  ;;  %v1372_v9 = vld [vmem:[#allocation5 + $0x1e4] sm:$0xf]  ;;  %v1026_v11 = vld [vmem:[#allocation5 + $0xc0] sm:$0xf] }
  0x17   :  { %v1047_v8 = vor.u32 %v1340_v5, %v1044_v6  ;;  %v1172_v10 = vld [vmem:[#allocation5 + $0x1f0] sm:$0xf0]  ;;  %483 = vmatpush.bf16.msra.mxu0 %v1043_v3  ;;  %v1338_v13 = vld [vmem:[#allocation5 + $0xcc] sm:$0xf0]  ;;  %v1154_v14 = vld [vmem:[#allocation5 + $0x1c0] sm:$0xf] }
  0x18   :  { %v1175_v12 = vor.u32 %v1372_v9, %v1172_v10  ;;  %v1370_v15 = vld [vmem:[#allocation5 + $0x1cc] sm:$0xf0]  ;;  %496 = vmatpush.bf16.msra.mxu1 %v1171_v7  ;;  %v1027_v16 = vor.u32 %v1338_v13, %v1026_v11  ;;  %v1336_v18 = vld [vmem:[#allocation5 + $0xc4] sm:$0xf]  ;;  %v1028_v19 = vld [vmem:[#allocation5 + $0xd0] sm:$0xf0] }
  0x19   :  { %509 = vmatpush.bf16.msra.mxu2 %v1047_v8  ;;  %v1155_v17 = vor.u32 %v1370_v15, %v1154_v14  ;;  %v1368_v20 = vld [vmem:[#allocation5 + $0x1c4] sm:$0xf]  ;;  %v1031_v21 = vor.u32 %v1336_v18, %v1028_v19  ;;  %v1156_v22 = vld [vmem:[#allocation5 + $0x1d0] sm:$0xf0]  ;;  %v1010_v23 = vld [vmem:[#allocation5 + $0xa0] sm:$0xf] }
  0x1a   :  { %522 = vmatpush.bf16.msra.mxu3 %v1175_v12  ;;  %v1334_v24 = vld [vmem:[#allocation5 + $0xac] sm:$0xf0]  ;;  %v1159_v25 = vor.u32 %v1368_v20, %v1156_v22  ;;  %v1138_v26 = vld [vmem:[#allocation5 + $0x1a0] sm:$0xf]  ;;  %v1332_v28 = vld [vmem:[#allocation5 + $0xa4] sm:$0xf] }
  0x1b   :  { %v1366_v27 = vld [vmem:[#allocation5 + $0x1ac] sm:$0xf0]  ;;  %484 = vmatpush.bf16.msra.mxu0 %v1027_v16  ;;  %v1011_v29 = vor.u32 %v1334_v24, %v1010_v23  ;;  %v1012_v30 = vld [vmem:[#allocation5 + $0xb0] sm:$0xf0]  ;;  %v1364_v31 = vld [vmem:[#allocation5 + $0x1a4] sm:$0xf] }
  0x1c   :  { %v1140_v32 = vld [vmem:[#allocation5 + $0x1b0] sm:$0xf0]  ;;  %497 = vmatpush.bf16.msra.mxu1 %v1155_v17  ;;  %v1139_v33 = vor.u32 %v1366_v27, %v1138_v26  ;;  %v1015_v34 = vor.u32 %v1332_v28, %v1012_v30  ;;  %v994_v35 = vld [vmem:[#allocation5 + $0x80] sm:$0xf]  ;;  %v1330_v36 = vld [vmem:[#allocation5 + $0x8c] sm:$0xf0] }
  0x1d   :  { %510 = vmatpush.bf16.msra.mxu2 %v1031_v21  ;;  %v1122_v37 = vld [vmem:[#allocation5 + $0x180] sm:$0xf]  ;;  %v1143_v38 = vor.u32 %v1364_v31, %v1140_v32  ;;  %v1362_v39 = vld [vmem:[#allocation5 + $0x18c] sm:$0xf0]  ;;  %v1328_v40 = vld [vmem:[#allocation5 + $0x84] sm:$0xf]  ;;  %v995_v44 = vor.u32 %v1330_v36, %v994_v35 }
  0x1e   :  { %523 = vmatpush.bf16.msra.mxu3 %v1159_v25  ;;  %v996_v41 = vld [vmem:[#allocation5 + $0x90] sm:$0xf0]  ;;  %v1360_v42 = vld [vmem:[#allocation5 + $0x184] sm:$0xf]  ;;  %v1123_v45 = vor.u32 %v1362_v39, %v1122_v37  ;;  %v978_v47 = vld [vmem:[#allocation5 + $0x60] sm:$0xf] }
  0x1f   :  { %v1124_v43 = vld [vmem:[#allocation5 + $0x190] sm:$0xf0]  ;;  %485 = vmatpush.bf16.msra.mxu0 %v1011_v29  ;;  %v999_v46 = vor.u32 %v1328_v40, %v996_v41  ;;  %v1326_v48 = vld [vmem:[#allocation5 + $0x6c] sm:$0xf0]  ;;  %v1106_v49 = vld [vmem:[#allocation5 + $0x160] sm:$0xf] }
  0x20   :  { %498 = vmatpush.bf16.msra.mxu1 %v1139_v33  ;;  %v1127_v50 = vor.u32 %v1360_v42, %v1124_v43  ;;  %v1358_v51 = vld [vmem:[#allocation5 + $0x16c] sm:$0xf0]  ;;  %v1324_v52 = vld [vmem:[#allocation5 + $0x64] sm:$0xf]  ;;  %v980_v53 = vld [vmem:[#allocation5 + $0x70] sm:$0xf0]  ;;  %v979_v56 = vor.u32 %v1326_v48, %v978_v47 }
  0x21   :  { %511 = vmatpush.bf16.msra.mxu2 %v1015_v34  ;;  %v1356_v54 = vld [vmem:[#allocation5 + $0x164] sm:$0xf]  ;;  %v1108_v55 = vld [vmem:[#allocation5 + $0x170] sm:$0xf0]  ;;  %v1107_v57 = vor.u32 %v1358_v51, %v1106_v49  ;;  %v983_v58 = vor.u32 %v1324_v52, %v980_v53  ;;  %v962_v59 = vld [vmem:[#allocation5 + $0x40] sm:$0xf] }
  0x22   :  { %524 = vmatpush.bf16.msra.mxu3 %v1143_v38  ;;  %v1322_v60 = vld [vmem:[#allocation5 + $0x4c] sm:$0xf0]  ;;  %v1090_v61 = vld [vmem:[#allocation5 + $0x140] sm:$0xf]  ;;  %v1111_v62 = vor.u32 %v1356_v54, %v1108_v55  ;;  %v1320_v0 = vld [vmem:[#allocation5 + $0x44] sm:$0xf] }
  0x23   :  { %486 = vmatpush.bf16.msra.mxu0 %v995_v44  ;;  %v1354_v63 = vld [vmem:[#allocation5 + $0x14c] sm:$0xf0]  ;;  %v964_v1 = vld [vmem:[#allocation5 + $0x50] sm:$0xf0]  ;;  %v1352_v2 = vld [vmem:[#allocation5 + $0x144] sm:$0xf]  ;;  %v963_v4 = vor.u32 %v1322_v60, %v962_v59 }
  0x24   :  { %499 = vmatpush.bf16.msra.mxu1 %v1123_v45  ;;  %v1092_v3 = vld [vmem:[#allocation5 + $0x150] sm:$0xf0]  ;;  %v1091_v5 = vor.u32 %v1354_v63, %v1090_v61  ;;  %v967_v6 = vor.u32 %v1320_v0, %v964_v1  ;;  %v946_v7 = vld [vmem:[#allocation5 + $0x20] sm:$0xf]  ;;  %v1318_v8 = vld [vmem:[#allocation5 + $0x2c] sm:$0xf0] }
  0x25   :  { %512 = vmatpush.bf16.msra.mxu2 %v999_v46  ;;  %v1074_v9 = vld [vmem:[#allocation5 + $0x120] sm:$0xf]  ;;  %v1095_v10 = vor.u32 %v1352_v2, %v1092_v3  ;;  %v1350_v11 = vld [vmem:[#allocation5 + $0x12c] sm:$0xf0]  ;;  %v1316_v12 = vld [vmem:[#allocation5 + $0x24] sm:$0xf]  ;;  %v947_v17 = vor.u32 %v1318_v8, %v946_v7 }
  0x26   :  { %525 = vmatpush.bf16.msra.mxu3 %v1127_v50  ;;  %v948_v13 = vld [vmem:[#allocation5 + $0x30] sm:$0xf0]  ;;  %v1348_v14 = vld [vmem:[#allocation5 + $0x124] sm:$0xf]  ;;  %v930_v16 = vld [vmem:[#allocation5] sm:$0xf]  ;;  %v1075_v21 = vor.u32 %v1350_v11, %v1074_v9 }
  0x27   :  { %487 = vmatpush.bf16.msra.mxu0 %v979_v56  ;;  %v1076_v15 = vld [vmem:[#allocation5 + $0x130] sm:$0xf0]  ;;  %v1314_v18 = vld [vmem:[#allocation5 + $0xc] sm:$0xf0]  ;;  %v1058_v19 = vld [vmem:[#allocation5 + $0x100] sm:$0xf]  ;;  %v951_v22 = vor.u32 %v1316_v12, %v948_v13 }
  0x28   :  { %500 = vmatpush.bf16.msra.mxu1 %v1107_v57  ;;  %v1346_v20 = vld [vmem:[#allocation5 + $0x10c] sm:$0xf0]  ;;  %v1312_v23 = vld [vmem:[#allocation5 + $0x4] sm:$0xf]  ;;  %v932_v24 = vld [vmem:[#allocation5 + $0x10] sm:$0xf0]  ;;  %v1079_v26 = vor.u32 %v1348_v14, %v1076_v15  ;;  %v931_v33 = vor.u32 %v1314_v18, %v930_v16 }
  0x29   :  { %513 = vmatpush.bf16.msra.mxu2 %v983_v58  ;;  %v1344_v25 = vld [vmem:[#allocation5 + $0x104] sm:$0xf]  ;;  %v1060_v27 = vld [vmem:[#allocation5 + $0x110] sm:$0xf0]  ;;  %v1050_v28 = vld [vmem:[#allocation5 + $0xe8] sm:$0xf]  ;;  %v1059_v36 = vor.u32 %v1346_v20, %v1058_v19  ;;  %v935_v37 = vor.u32 %v1312_v23, %v932_v24 }
  0x2a   :  { %526 = vmatpush.bf16.msra.mxu3 %v1111_v62  ;;  %v1343_v29 = vld [vmem:[#allocation5 + $0xf4] sm:$0xf0]  ;;  %v1178_v30 = vld [vmem:[#allocation5 + $0x1e8] sm:$0xf]  ;;  %v80_v32 = vld [vmem:[#allocation2] sm:$0xf]  ;;  %v1063_v40 = vor.u32 %v1344_v25, %v1060_v27 }
  0x2b   :  { %488 = vmatpush.bf16.msra.mxu0 %v963_v4  ;;  %v1375_v31 = vld [vmem:[#allocation5 + $0x1f4] sm:$0xf0]  ;;  %v1341_v34 = vld [vmem:[#allocation5 + $0xec] sm:$0xf]  ;;  %v1052_v35 = vld [vmem:[#allocation5 + $0xf8] sm:$0xf0]  ;;  %v1051_v41 = vor.u32 %v1343_v29, %v1050_v28 }
  0x2c   :  { %501 = vmatpush.bf16.msra.mxu1 %v1091_v5  ;;  %82 = vst [vmem:[#allocation1] ss:$4 sm:$0xff] %v80_v32  ;;  %v1373_v38 = vld [vmem:[#allocation5 + $0x1ec] sm:$0xf]  ;;  %v1180_v39 = vld [vmem:[#allocation5 + $0x1f8] sm:$0xf0]  ;;  %v1179_v42 = vor.u32 %v1375_v31, %v1178_v30  ;;  %v1055_v43 = vor.u32 %v1341_v34, %v1052_v35 }
  0x2d   :  { %514 = vmatpush.bf16.msra.mxu2 %v967_v6  ;;  %v1034_v44 = vld [vmem:[#allocation5 + $0xc8] sm:$0xf]  ;;  %v1339_v45 = vld [vmem:[#allocation5 + $0xd4] sm:$0xf0]  ;;  %v1183_v47 = vor.u32 %v1373_v38, %v1180_v39  ;;  %v1337_v49 = vld [vmem:[#allocation5 + $0xcc] sm:$0xf] }
  0x2e   :  { %527 = vmatpush.bf16.msra.mxu3 %v1095_v10  ;;  %v1162_v46 = vld [vmem:[#allocation5 + $0x1c8] sm:$0xf]  ;;  %v1371_v48 = vld [vmem:[#allocation5 + $0x1d4] sm:$0xf0]  ;;  %v1036_v50 = vld [vmem:[#allocation5 + $0xd8] sm:$0xf0]  ;;  %v1035_v53 = vor.u32 %v1339_v45, %v1034_v44 }
  0x2f   :  { %489 = vmatpush.bf16.msra.mxu0 %v947_v17  ;;  %v1369_v51 = vld [vmem:[#allocation5 + $0x1cc] sm:$0xf]  ;;  %v1164_v52 = vld [vmem:[#allocation5 + $0x1d8] sm:$0xf0]  ;;  %v1018_v54 = vld [vmem:[#allocation5 + $0xa8] sm:$0xf]  ;;  %v1163_v57 = vor.u32 %v1371_v48, %v1162_v46  ;;  %v1039_v58 = vor.u32 %v1337_v49, %v1036_v50 }
  0x30   :  { %502 = vmatpush.bf16.msra.mxu1 %v1075_v21  ;;  %v1335_v55 = vld [vmem:[#allocation5 + $0xb4] sm:$0xf0]  ;;  %v1146_v56 = vld [vmem:[#allocation5 + $0x1a8] sm:$0xf]  ;;  %v1167_v61 = vor.u32 %v1369_v51, %v1164_v52  ;;  %v1333_v0 = vld [vmem:[#allocation5 + $0xac] sm:$0xf] }
  0x31   :  { %515 = vmatpush.bf16.msra.mxu2 %v951_v22  ;;  %v1367_v63 = vld [vmem:[#allocation5 + $0x1b4] sm:$0xf0]  ;;  %v1020_v1 = vld [vmem:[#allocation5 + $0xb8] sm:$0xf0]  ;;  %v1365_v2 = vld [vmem:[#allocation5 + $0x1ac] sm:$0xf]  ;;  %v1019_v5 = vor.u32 %v1335_v55, %v1018_v54 }
  0x32   :  { %528 = vmatpush.bf16.msra.mxu3 %v1079_v26  ;;  %v1148_v3 = vld [vmem:[#allocation5 + $0x1b8] sm:$0xf0]  ;;  %v1147_v6 = vor.u32 %v1367_v63, %v1146_v56  ;;  %v1023_v7 = vor.u32 %v1333_v0, %v1020_v1  ;;  %v1002_v8 = vld [vmem:[#allocation5 + $0x88] sm:$0xf]  ;;  %v1331_v9 = vld [vmem:[#allocation5 + $0x94] sm:$0xf0] }
  0x33   :  { %490 = vmatpush.bf16.msra.mxu0 %v931_v33  ;;  %v83_v59 = vld.sshfl [vmem:[#allocation1] sm:$0xff pattern:$0x73625140]  ;;  %v84_v60 = vld.sshfl [vmem:[#allocation1 + $0x8] sm:$0xff pattern:$0x73625140]  ;;  %v1151_v11 = vor.u32 %v1365_v2, %v1148_v3  ;;  %v1003_v17 = vor.u32 %v1331_v9, %v1002_v8 }
  0x34   :  { %503 = vmatpush.bf16.msra.mxu1 %v1059_v36  ;;  %v1597_v62 = vpack.c.bf16 %v83_v59, %v83_v59  ;;  %v1599_v4 = vpack.c.bf16 %v84_v60, %v84_v60  ;;  %v1130_v10 = vld [vmem:[#allocation5 + $0x188] sm:$0xf]  ;;  %v1363_v12 = vld [vmem:[#allocation5 + $0x194] sm:$0xf0]  ;;  %v1329_v13 = vld [vmem:[#allocation5 + $0x8c] sm:$0xf] }
  0x35   :  { %516 = vmatpush.bf16.msra.mxu2 %v935_v37  ;;  %v1004_v14 = vld [vmem:[#allocation5 + $0x98] sm:$0xf0]  ;;  %v1361_v15 = vld [vmem:[#allocation5 + $0x18c] sm:$0xf]  ;;  %v1131_v18 = vor.u32 %v1363_v12, %v1130_v10  ;;  %v986_v20 = vld [vmem:[#allocation5 + $0x68] sm:$0xf] }
  0x36   :  { %529 = vmatpush.bf16.msra.mxu3 %v1063_v40  ;;  %491 = vmatmul.bf16.vlgmr.msra.gmra.mxu0 %v1597_v62  ;;  %v1132_v16 = vld [vmem:[#allocation5 + $0x198] sm:$0xf0]  ;;  %v1007_v19 = vor.u32 %v1329_v13, %v1004_v14  ;;  %v1327_v21 = vld [vmem:[#allocation5 + $0x74] sm:$0xf0]  ;;  %v1114_v22 = vld [vmem:[#allocation5 + $0x168] sm:$0xf] }
  0x37   :  { %535 = vmatpush.bf16.msrb.mxu0 %v1051_v41  ;;  %504 = vmatmul.bf16.vlgmr.msra.gmra.mxu1 %v1599_v4  ;;  %v1135_v23 = vor.u32 %v1361_v15, %v1132_v16  ;;  %v1359_v24 = vld [vmem:[#allocation5 + $0x174] sm:$0xf0]  ;;  %v1325_v25 = vld [vmem:[#allocation5 + $0x6c] sm:$0xf]  ;;  %v988_v26 = vld [vmem:[#allocation5 + $0x78] sm:$0xf0]  ;;  %v987_v29 = vor.u32 %v1327_v21, %v986_v20 }
  0x38   :  { %548 = vmatpush.bf16.msrb.mxu1 %v1179_v42  ;;  %517 = vmatmul.bf16.vlgmr.msra.gmra.mxu2 %v1597_v62  ;;  %v1357_v27 = vld [vmem:[#allocation5 + $0x16c] sm:$0xf]  ;;  %v1116_v28 = vld [vmem:[#allocation5 + $0x178] sm:$0xf0]  ;;  %v970_v30 = vld [vmem:[#allocation5 + $0x48] sm:$0xf]  ;;  %v1115_v31 = vor.u32 %v1359_v24, %v1114_v22  ;;  %v991_v32 = vor.u32 %v1325_v25, %v988_v26 }
  0x39   :  { %561 = vmatpush.bf16.msrb.mxu2 %v1055_v43  ;;  %530 = vmatmul.bf16.vlgmr.msra.gmra.mxu3 %v1599_v4  ;;  %v1323_v33 = vld [vmem:[#allocation5 + $0x54] sm:$0xf0]  ;;  %v1098_v34 = vld [vmem:[#allocation5 + $0x148] sm:$0xf]  ;;  %v1119_v36 = vor.u32 %v1357_v27, %v1116_v28  ;;  %v1321_v37 = vld [vmem:[#allocation5 + $0x4c] sm:$0xf] }
  0x3a   :  { %574 = vmatpush.bf16.msrb.mxu3 %v1183_v47  ;;  %v1355_v35 = vld [vmem:[#allocation5 + $0x154] sm:$0xf0]  ;;  %v972_v38 = vld [vmem:[#allocation5 + $0x58] sm:$0xf0]  ;;  %v1353_v39 = vld [vmem:[#allocation5 + $0x14c] sm:$0xf]  ;;  %v971_v41 = vor.u32 %v1323_v33, %v970_v30 }
  0x3b   :  { %536 = vmatpush.bf16.msrb.mxu0 %v1035_v53  ;;  %v1100_v40 = vld [vmem:[#allocation5 + $0x158] sm:$0xf0]  ;;  %v1099_v42 = vor.u32 %v1355_v35, %v1098_v34  ;;  %v975_v43 = vor.u32 %v1321_v37, %v972_v38  ;;  %v954_v44 = vld [vmem:[#allocation5 + $0x28] sm:$0xf]  ;;  %v1319_v45 = vld [vmem:[#allocation5 + $0x34] sm:$0xf0] }
  0x3c   :  { %549 = vmatpush.bf16.msrb.mxu1 %v1163_v57  ;;  %v1082_v46 = vld [vmem:[#allocation5 + $0x128] sm:$0xf]  ;;  %v1103_v47 = vor.u32 %v1353_v39, %v1100_v40  ;;  %v1351_v48 = vld [vmem:[#allocation5 + $0x134] sm:$0xf0]  ;;  %v1317_v49 = vld [vmem:[#allocation5 + $0x2c] sm:$0xf]  ;;  %v955_v53 = vor.u32 %v1319_v45, %v954_v44 }
  0x3d   :  { %562 = vmatpush.bf16.msrb.mxu2 %v1039_v58  ;;  %v956_v50 = vld [vmem:[#allocation5 + $0x38] sm:$0xf0]  ;;  %v1349_v51 = vld [vmem:[#allocation5 + $0x12c] sm:$0xf]  ;;  %v1083_v54 = vor.u32 %v1351_v48, %v1082_v46  ;;  %v938_v56 = vld [vmem:[#allocation5 + $0x8] sm:$0xf] }
  0x3e   :  { %575 = vmatpush.bf16.msrb.mxu3 %v1167_v61  ;;  %v1084_v52 = vld [vmem:[#allocation5 + $0x138] sm:$0xf0]  ;;  %v959_v55 = vor.u32 %v1317_v49, %v956_v50  ;;  %v1315_v57 = vld [vmem:[#allocation5 + $0x14] sm:$0xf0]  ;;  %v1066_v58 = vld [vmem:[#allocation5 + $0x108] sm:$0xf] }
  0x3f   :  { %537 = vmatpush.bf16.msrb.mxu0 %v1019_v5  ;;  %v1087_v59 = vor.u32 %v1349_v51, %v1084_v52  ;;  %v1347_v60 = vld [vmem:[#allocation5 + $0x114] sm:$0xf0]  ;;  %v1313_v61 = vld [vmem:[#allocation5 + $0xc] sm:$0xf]  ;;  %v940_v63 = vld [vmem:[#allocation5 + $0x18] sm:$0xf0]  ;;  %v939_v2 = vor.u32 %v1315_v57, %v938_v56 }
  0x40   :  { %550 = vmatpush.bf16.msrb.mxu1 %v1147_v6  ;;  %v1345_v0 = vld [vmem:[#allocation5 + $0x10c] sm:$0xf]  ;;  %v1068_v1 = vld [vmem:[#allocation5 + $0x118] sm:$0xf0]  ;;  %v1067_v3 = vor.u32 %v1347_v60, %v1066_v58  ;;  %v943_v5 = vor.u32 %v1313_v61, %v940_v63  ;;  %v1382_v10 = vld [vmem:[#allocation8 + $0x30] sm:$0xff]  ;;  %s1554_s15 = smov [#allocation10]  }
  0x41   :  { %563 = vmatpush.bf16.msrb.mxu2 %v1023_v7  ;;  %v1071_v6 = vor.u32 %v1345_v0, %v1068_v1  ;;  %v1383_v7 = vld [vmem:[#allocation8 + $0x38] sm:$0xff]  ;;  %v1381_v12 = vld [vmem:[#allocation8 + $0x28] sm:$0xff]  ;;  %v1380_v14 = vld [vmem:[#allocation8 + $0x20] sm:$0xff]  ;;  %s914_s16 = sshll.u32 %s1554_s15, 4  ;;  %s916_s19 = sshll.u32 %s1620_s5, 4  ;;  %s915_s16 = int_to_ptr.vmem [resolvable:$true] %s914_s16  ;;  %s917_s19 = int_to_ptr.hbm [resolvable:$true] %s916_s19 }
  0x42   :  { %576 = vmatpush.bf16.msrb.mxu3 %v1151_v11  ;;  %v1391_v8 = vld [vmem:[#allocation8 + $0x78] sm:$0xff]  ;;  %v1390_v11 = vld [vmem:[#allocation8 + $0x70] sm:$0xff]  ;;  %v1389_v13 = vld [vmem:[#allocation8 + $0x68] sm:$0xff] }
  0x43   :  { %538 = vmatpush.bf16.msrb.mxu0 %v1003_v17  ;;  %v1399_v9 = vld [vmem:[#allocation8 + $0xb8] sm:$0xff]  ;;  %v1388_v15 = vld [vmem:[#allocation8 + $0x60] sm:$0xff]  ;;  %v1385_v20 = vld [vmem:[#allocation8 + $0x48] sm:$0xff] }
  0x44   :  { %551 = vmatpush.bf16.msrb.mxu1 %v1131_v18  ;;  %v1379_v16 = vld [vmem:[#allocation8 + $0x18] sm:$0xff]  ;;  %v1378_v18 = vld [vmem:[#allocation8 + $0x10] sm:$0xff]  ;;  %v1397_v22 = vld [vmem:[#allocation8 + $0xa8] sm:$0xff] }
  0x45   :  { %564 = vmatpush.bf16.msrb.mxu2 %v1007_v19  ;;  %v1387_v17 = vld [vmem:[#allocation8 + $0x58] sm:$0xff]  ;;  %v1386_v19 = vld [vmem:[#allocation8 + $0x50] sm:$0xff]  ;;  %v1384_v24 = vld [vmem:[#allocation8 + $0x40] sm:$0xff] }
  0x46   :  { %577 = vmatpush.bf16.msrb.mxu3 %v1135_v23  ;;  %v1407_v21 = vld [vmem:[#allocation8 + $0xf8] sm:$0xff]  ;;  %v1376_v23 = vld [vmem:[#allocation8] sm:$0xff]  ;;  %v1406_v25 = vld [vmem:[#allocation8 + $0xf0] sm:$0xff] }
  0x47   :  { %539 = vmatpush.bf16.msrb.mxu0 %v987_v29  ;;  %v1396_v26 = vld [vmem:[#allocation8 + $0xa0] sm:$0xff]  ;;  %v1405_v27 = vld [vmem:[#allocation8 + $0xe8] sm:$0xff]  ;;  %v1395_v28 = vld [vmem:[#allocation8 + $0x98] sm:$0xff] }
  0x48   :  { %552 = vmatpush.bf16.msrb.mxu1 %v1115_v31  ;;  %v1404_v29 = vld [vmem:[#allocation8 + $0xe0] sm:$0xff]  ;;  %v1394_v30 = vld [vmem:[#allocation8 + $0x90] sm:$0xff]  ;;  %v1403_v31 = vld [vmem:[#allocation8 + $0xd8] sm:$0xff] }
  0x49   :  { %565 = vmatpush.bf16.msrb.mxu2 %v991_v32  ;;  %v153_v32 = vld [vmem:[#allocation7] sm:$0xf]  ;;  %v1393_v33 = vld [vmem:[#allocation8 + $0x88] sm:$0xff]  ;;  %v1402_v35 = vld [vmem:[#allocation8 + $0xd0] sm:$0xff] }
  0x4a   :  { %578 = vmatpush.bf16.msrb.mxu3 %v1119_v36  ;;  %v155_v34 = vperm.slane %v153_v32, 0  ;;  %v1392_v36 = vld [vmem:[#allocation8 + $0x80] sm:$0xff]  ;;  %v156_v39 = vperm.slane %v153_v32, 1  ;;  %v157_v56 = vperm.slane %v153_v32, 2  ;;  %v158_v61 = vperm.slane %v153_v32, 3 }
  0x4b   :  { %540 = vmatpush.bf16.msrb.mxu0 %v971_v41  ;;  %v1401_v41 = vld [vmem:[#allocation8 + $0xc8] sm:$0xff]  ;;  %v1400_v46 = vld [vmem:[#allocation8 + $0xc0] sm:$0xff] }
  0x4c   :  { %553 = vmatpush.bf16.msrb.mxu1 %v1099_v42 }
  0x4d   :  { %566 = vmatpush.bf16.msrb.mxu2 %v975_v43 }
  0x4e   :  { %579 = vmatpush.bf16.msrb.mxu3 %v1103_v47 }
  0x4f   :  { %541 = vmatpush.bf16.msrb.mxu0 %v955_v53 }
  0x50   :  { %554 = vmatpush.bf16.msrb.mxu1 %v1083_v54 }
  0x51   :  { %567 = vmatpush.bf16.msrb.mxu2 %v959_v55 }
  0x52   :  { %580 = vmatpush.bf16.msrb.mxu3 %v1087_v59 }
  0x53   :  { %542 = vmatpush.bf16.msrb.mxu0 %v939_v2 }
  0x54   :  { %555 = vmatpush.bf16.msrb.mxu1 %v1067_v3 }
  0x55   :  { %568 = vmatpush.bf16.msrb.mxu2 %v943_v5 }
  0x56   :  { %581 = vmatpush.bf16.msrb.mxu3 %v1071_v6  ;;  %543 = vmatmul.bf16.vlgmr.msrb.gmra.mxu0 %v1597_v62 }
  0x57   :  { %855 = vmatpush.bf16.msra.mxu0 %v1383_v7  ;;  %556 = vmatmul.bf16.vlgmr.msrb.gmra.mxu1 %v1599_v4 }
  0x58   :  { %868 = vmatpush.bf16.msra.mxu1 %v1391_v8  ;;  %569 = vmatmul.bf16.vlgmr.msrb.gmra.mxu2 %v1597_v62  ;;  %v1398_v62 = vld [vmem:[#allocation8 + $0xb0] sm:$0xff] }
  0x59   :  { %582 = vmatmul.bf16.vlgmr.msrb.gmra.mxu3 %v1599_v4  ;;  %881 = vmatpush.bf16.msra.mxu2 %v1399_v9  ;;  %v1377_v4 = vld [vmem:[#allocation8 + $0x8] sm:$0xff] }
  0x5a   :  { %894 = vmatpush.bf16.msra.mxu3 %v1407_v21 }
  0x5b   :  { %856 = vmatpush.bf16.msra.mxu0 %v1382_v10 }
  0x5c   :  { %869 = vmatpush.bf16.msra.mxu1 %v1390_v11 }
  0x5d   :  { %882 = vmatpush.bf16.msra.mxu2 %v1398_v62 }
  0x5e   :  { %895 = vmatpush.bf16.msra.mxu3 %v1406_v25 }
  0x5f   :  { %857 = vmatpush.bf16.msra.mxu0 %v1381_v12 }
  0x60   :  { %870 = vmatpush.bf16.msra.mxu1 %v1389_v13 }
  0x61   :  { %883 = vmatpush.bf16.msra.mxu2 %v1397_v22 }
  0x62   :  { %896 = vmatpush.bf16.msra.mxu3 %v1405_v27 }
  0x63   :  { %858 = vmatpush.bf16.msra.mxu0 %v1380_v14 }
  0x64   :  { %871 = vmatpush.bf16.msra.mxu1 %v1388_v15 }
  0x65   :  { %884 = vmatpush.bf16.msra.mxu2 %v1396_v26 }
  0x66   :  { %897 = vmatpush.bf16.msra.mxu3 %v1404_v29 }
  0x67   :  { %859 = vmatpush.bf16.msra.mxu0 %v1379_v16  ;;  %v1417_v16 = vld [vmem:[%s1619_s4] ss:$0 sm:$0xff] }
  0x68   :  { %872 = vmatpush.bf16.msra.mxu1 %v1387_v17 }
  0x69   :  { %885 = vmatpush.bf16.msra.mxu2 %v1395_v28 }
  0x6a   :  { %898 = vmatpush.bf16.msra.mxu3 %v1403_v31 }
  0x6b   :  { %860 = vmatpush.bf16.msra.mxu0 %v1378_v18 }
  0x6c   :  { %873 = vmatpush.bf16.msra.mxu1 %v1386_v19 }
  0x6d   :  { %886 = vmatpush.bf16.msra.mxu2 %v1394_v30 }
  0x6e   :  { %899 = vmatpush.bf16.msra.mxu3 %v1402_v35 }
  0x6f   :  { %861 = vmatpush.bf16.msra.mxu0 %v1377_v4 }
  0x70   :  { %874 = vmatpush.bf16.msra.mxu1 %v1385_v20 }
  0x71   :  { %887 = vmatpush.bf16.msra.mxu2 %v1393_v33 }
  0x72   :  { %900 = vmatpush.bf16.msra.mxu3 %v1401_v41 }
  0x73   :  { %862 = vmatpush.bf16.msra.mxu0 %v1376_v23 }
  0x74   :  { %875 = vmatpush.bf16.msra.mxu1 %v1384_v24 }
  0x75   :  { %888 = vmatpush.bf16.msra.mxu2 %v1392_v36 }
  0x76   :  { %901 = vmatpush.bf16.msra.mxu3 %v1400_v46 }
  0xb3   :  { %v492_v37 = vpop.f32.mrf.mxu0 }
  0xb4   :  { %v493_v38 = vadd.f32 %v492_v37, %v155_v34  ;;  %v505_v40 = vpop.f32.mrf.mxu1 }
  0xb6   :  { %v506_v42 = vadd.f32 %v505_v40, %v493_v38 }
  0xb8   :  { %v587_v45 = vmax.f32 %v506_v42, 0.0 }
  0xba   :  { %v591_v47 = vpack.c.bf16 %v587_v45, %v587_v45 }
  0xbb   :  { %v518_v43 = vpop.f32.mrf.mxu2  ;;  %v494_v50 = vpop.f32.mrf.mxu0 }
  0xbc   :  { %v519_v44 = vadd.f32 %v518_v43, %v156_v39  ;;  %v531_v48 = vpop.f32.mrf.mxu3  ;;  %863 = vmatmul.bf16.vlgmr.msra.gmra.mxu0 %v591_v47  ;;  %v507_v51 = vpop.f32.mrf.mxu1 }
  0xbe   :  { %v532_v49 = vadd.f32 %v531_v48, %v519_v44 }
  0xc0   :  { %v588_v52 = vmax.f32 %v532_v49, 0.0 }
  0xc2   :  { %v592_v53 = vpack.c.bf16 %v588_v52, %v588_v52 }
  0xc3   :  { %v520_v54 = vpop.f32.mrf.mxu2 }
  0xc4   :  { %876 = vmatmul.bf16.vlgmr.msra.gmra.mxu1 %v592_v53  ;;  %v533_v55 = vpop.f32.mrf.mxu3 }
  0xd3   :  { %v544_v57 = vpop.f32.mrf.mxu0 }
  0xd4   :  { %v545_v58 = vadd.f32 %v544_v57, %v157_v56  ;;  %v557_v59 = vpop.f32.mrf.mxu1 }
  0xd6   :  { %v558_v60 = vadd.f32 %v557_v59, %v545_v58 }
  0xd8   :  { %v589_v63 = vmax.f32 %v558_v60, 0.0 }
  0xda   :  { %v593_v0 = vpack.c.bf16 %v589_v63, %v589_v63 }
  0xdb   :  { %v570_v1 = vpop.f32.mrf.mxu2  ;;  %v546_v5 = vpop.f32.mrf.mxu0 }
  0xdc   :  { %v571_v2 = vadd.f32 %v570_v1, %v158_v61  ;;  %v583_v3 = vpop.f32.mrf.mxu3  ;;  %v559_v6 = vpop.f32.mrf.mxu1  ;;  %889 = vmatmul.bf16.vlgmr.msra.gmra.mxu2 %v593_v0 }
  0xde   :  { %v584_v7 = vadd.f32 %v583_v3, %v571_v2 }
  0xe0   :  { %v590_v8 = vmax.f32 %v584_v7, 0.0 }
  0xe2   :  { %v594_v9 = vpack.c.bf16 %v590_v8, %v590_v8 }
  0xe3   :  { %v572_v10 = vpop.f32.mrf.mxu2 }
  0xe4   :  { %v585_v11 = vpop.f32.mrf.mxu3  ;;  %902 = vmatmul.bf16.vlgmr.msra.gmra.mxu3 %v594_v9 }
 0x139   :  { %v864_v12 = vpop.f32.mrf.mxu0 }
 0x13a   :  { %v865_v17 = vadd.f32 %v1417_v16, %v864_v12 }
 0x141   :  { %v877_v13 = vpop.f32.mrf.mxu1  ;;  %v866_v14 = vpop.f32.mrf.mxu0 }
 0x142   :  { %v878_v19 = vadd.f32 %v877_v13, %v865_v17 }
 0x149   :  { %v879_v15 = vpop.f32.mrf.mxu1 }
 0x15f   :  { %v890_v18 = vpop.f32.mrf.mxu2 }
 0x160   :  { %v891_v62 = vadd.f32 %v890_v18, %v878_v19 }
 0x167   :  { %v903_v4 = vpop.f32.mrf.mxu3  ;;  %v892_v21 = vpop.f32.mrf.mxu2 }
 0x168   :  { %v904_v20 = vadd.f32 %v903_v4, %v891_v62 }
 0x16a   :  { %v907_v22 = vmax.f32 %v904_v20, 0.0 }
 0x16c   :  { %908 = vst [vmem:[#allocation10] sm:$0x3] %v907_v22 }
 0x16d   :  { %919 = dma.vmem_to_hbm [thread:$0]  %s915_s16, 32, %s917_s19, [#allocation4]  }
 0x16f   :  { %v905_v23 = vpop.f32.mrf.mxu3 }
 0x170   :  { %1544 = dma.done.wait [#allocation4], 32  }
 0x171   :  { %1545 = vsyncadd [#allocation4], 4294967264 }
 0x172   :  { %924 = vsyncpa [#allocation3], 1 }
 0x173   :  { %925 = vsyncpa [#allocation6], 1 }
 0x174   :  { %926 = vsyncpa [#allocation9], 1 }
 0x175   :  { %927 = vsyncpa [#allocation4], 1 }

</bundles_post_ra>
